<compile_context>
chip_gen: v5e
topology: v5e:2x2
jax: 0.10.0
libtpu: 0.0.40
codegen_flags: <defaults>
</compile_context>

<pallas_src>
import jax
import jax.numpy as jnp
from jax.experimental import pallas as pl
from jax.experimental.pallas import tpu as pltpu

LANES = 128          # lane width of a vreg
MAX_SUB_ROWS = 2048  # cap: 8*2048*128 input block (4 MiB bf16 / 8 MiB f32) x2 buffers
                     # + 2 MiB double-buffered f32 output stays well under 32 MiB VMEM


def _round_up(a, m):
    return ((a + m - 1) // m) * m


def _dense_tanh(rows, w_ref, b_ref, out_dim, in_dim):
    """rows: list of (sub, 128) f32 tiles, one per input feature.
    w_ref: (out_dim, in_dim) f32 SMEM (torch layout, pre-folded); b_ref: (out_dim,) SMEM.
    Returns out_dim tiles of tanh(W @ rows + b) as unrolled VPU MACs + one EUP tanh."""
    outs = []
    for j in range(out_dim):
        acc = rows[0] * w_ref[j, 0]
        for k in range(1, in_dim):
            acc = acc + rows[k] * w_ref[j, k]
        outs.append(jnp.tanh(acc + b_ref[j]))
    return outs


def mlp_kernel(x_ref, w1_ref, b1_ref, w2_ref, b2_ref, w3_ref, b3_ref, o_ref):
    # x_ref: (8, sub, 128) VMEM tile (bf16 or f32); folded weights/biases in SMEM;
    # o_ref: (sub, 128) f32, lane-dense (unmasked stores).
    x_rows = [x_ref[k].astype(jnp.float32) for k in range(8)]
    t1 = _dense_tanh(x_rows, w1_ref, b1_ref, 6, 8)   # tanh only: affine folded forward
    t2 = _dense_tanh(t1, w2_ref, b2_ref, 4, 6)
    acc = t2[0] * w3_ref[0, 0]
    for k in range(1, 4):
        acc = acc + t2[k] * w3_ref[0, k]
    # Only the final sigmoid's affine stays in-kernel.
    o_ref[...] = 0.5 * jnp.tanh(acc + b3_ref[0]) + 0.5


def _fold_weights(w1, b1, w2, b2, w3, b3):
    """Fold sigmoid(z) = 0.5*tanh(0.5*z) + 0.5 into the weights (exact algebra).

    Layer 1:  t1 = tanh(x @ (0.5*W1).T + 0.5*b1)                    (h1 = 0.5*t1 + 0.5)
    Layer 2:  t2 = tanh(t1 @ (0.25*W2).T + 0.5*b2 + 0.25*sum_k W2)  (h2 = 0.5*t2 + 0.5)
    Layer 3:  y  = 0.5*tanh(t2 @ (0.25*W3).T + 0.5*b3 + 0.25*sum_k W3) + 0.5
    """
    f32 = jnp.float32
    w1f = (0.5 * w1).astype(f32)
    b1f = (0.5 * b1).astype(f32)
    w2f = (0.25 * w2).astype(f32)
    b2f = (0.5 * b2 + 0.25 * jnp.sum(w2, axis=1)).astype(f32)
    w3f = (0.25 * w3).astype(f32)
    b3f = (0.5 * b3 + 0.25 * jnp.sum(w3, axis=1)).astype(f32)
    return w1f, b1f, w2f, b2f, w3f, b3f


def mlp_forward(x, w1, b1, w2, b2, w3, b3, *,
                max_sub_rows=MAX_SUB_ROWS, input_dtype=jnp.bfloat16):
    n, feat = x.shape
    assert feat == 8

    w1f, b1f, w2f, b2f, w3f, b3f = _fold_weights(w1, b1, w2, b2, w3, b3)

    # (sub, 128) block alignment on the second-to-last dim: 16 for bf16, 8 for f32.
    align = 16 if input_dtype == jnp.bfloat16 else 8

    rows = pl.cdiv(n, LANES)                               # batch sublane-rows
    num_steps = pl.cdiv(rows, max_sub_rows)                # grid steps
    sub = _round_up(pl.cdiv(rows, num_steps), align)       # rows per step (minimal pad)
    rows_pad = sub * num_steps
    n_pad = rows_pad * LANES

    # Single-copy layout transform: cast -> transpose -> pad lane dim -> reshape.
    x_t = x.astype(input_dtype).T                          # (8, n), feature-major
    if n_pad != n:
        x_t = jnp.pad(x_t, ((0, 0), (0, n_pad - n)))       # skip entirely when aligned
    x_t = x_t.reshape(feat, rows_pad, LANES)

    smem = pl.BlockSpec(memory_space=pltpu.MemorySpace.SMEM)

    out = pl.pallas_call(
        mlp_kernel,
        out_shape=jax.ShapeDtypeStruct((rows_pad, LANES), jnp.float32),
        grid=(num_steps,),
        in_specs=[
            pl.BlockSpec((feat, sub, LANES), lambda i: (0, i, 0)),
            smem, smem, smem, smem, smem, smem,
        ],
        out_specs=pl.BlockSpec((sub, LANES), lambda i: (i, 0)),
        compiler_params=pltpu.CompilerParams(
            dimension_semantics=("parallel",),   # megacore-shard batch on v7x
            vmem_limit_bytes=32 * 1024 * 1024,
        ),
    )(x_t, w1f, b1f, w2f, b2f, w3f, b3f)

    # Lane-dense (rows_pad, 128) result -> (n, 1), dropping the padded tail.
    return out.reshape(n_pad, 1)[:n]


def init_linear(key, fan_in, fan_out):
    # torch.nn.Linear default init: U(-1/sqrt(fan_in), 1/sqrt(fan_in)),
    # weight stored (out_features, in_features), bias (out_features,).
    kw, kb = jax.random.split(key)
    bound = 1.0 / (fan_in ** 0.5)
    w = jax.random.uniform(kw, (fan_out, fan_in), jnp.float32, -bound, bound)
    b = jax.random.uniform(kb, (fan_out,), jnp.float32, -bound, bound)
    return w, b


def reference(x, w1, b1, w2, b2, w3, b3):
    h = jax.nn.sigmoid(x @ w1.T + b1)
    h = jax.nn.sigmoid(h @ w2.T + b2)
    return jax.nn.sigmoid(h @ w3.T + b3)


if __name__ == "__main__":
    key = jax.random.PRNGKey(0)
    kx, k1, k2, k3 = jax.random.split(key, 4)

    w1, b1 = init_linear(k1, 8, 6)
    w2, b2 = init_linear(k2, 6, 4)
    w3, b3 = init_linear(k3, 4, 1)

    # 1) Small, non-128-aligned batch; f32 streaming path (tight tolerance,
    #    verifies exactness of the folded-weight algebra + padding handling).
    batch = 300
    x = jax.random.normal(kx, (batch, 8), jnp.float32)
    ref = reference(x, w1, b1, w2, b2, w3, b3)
    out_f32 = jax.block_until_ready(
        mlp_forward(x, w1, b1, w2, b2, w3, b3, input_dtype=jnp.float32))
    assert out_f32.shape == (batch, 1)
    assert jnp.allclose(out_f32, ref, atol=1e-5, rtol=1e-5)

    # 2) Same batch on the default bf16-streaming path (looser tolerance).
    out_bf16 = jax.block_until_ready(mlp_forward(x, w1, b1, w2, b2, w3, b3))
    assert out_bf16.shape == (batch, 1)
    assert jnp.allclose(out_bf16, ref, atol=1e-2, rtol=1e-2)

    # 3) Multi-step pipelined grid path: 6144 = 48 sublane-rows, max_sub_rows=16
    #    -> 3 grid steps, exact fit (no padding), bf16 streaming.
    batch2 = 6144
    x2 = jax.random.normal(kx, (batch2, 8), jnp.float32)
    ref2 = reference(x2, w1, b1, w2, b2, w3, b3)
    out2 = jax.block_until_ready(
        mlp_forward(x2, w1, b1, w2, b2, w3, b3, max_sub_rows=16))
    assert out2.shape == (batch2, 1)
    assert jnp.allclose(out2, ref2, atol=1e-2, rtol=1e-2)

    print("KERNEL_OK")
</pallas_src>

<mosaic_0001>
module attributes {stable_mosaic.version = 11 : i64} {
  func.func @mlp_kernel(%arg0: i32, %arg1: memref<8x8x128xf32, #tpu.memory_space<vmem>>, %arg2: memref<6x8xf32, #tpu.memory_space<smem>>, %arg3: memref<6xf32, #tpu.memory_space<smem>>, %arg4: memref<4x6xf32, #tpu.memory_space<smem>>, %arg5: memref<4xf32, #tpu.memory_space<smem>>, %arg6: memref<1x4xf32, #tpu.memory_space<smem>>, %arg7: memref<1xf32, #tpu.memory_space<smem>>, %arg8: memref<8x128xf32, #tpu.memory_space<vmem>>) attributes {dimension_semantics = [#tpu.dimension_semantics<parallel>], iteration_bounds = array<i64: 1>, scalar_prefetch = 0 : i64, scratch_operands = 0 : i64, tpu.core_type = #tpu.core_type<tc>, window_params = [{transform_indices = @transform_0, window_bounds = array<i64: 8, 8, 128>}, {transform_indices = @transform_1, window_bounds = array<i64: 6, 8>}, {transform_indices = @transform_2, window_bounds = array<i64: 6>}, {transform_indices = @transform_3, window_bounds = array<i64: 4, 6>}, {transform_indices = @transform_4, window_bounds = array<i64: 4>}, {transform_indices = @transform_5, window_bounds = array<i64: 1, 4>}, {transform_indices = @transform_6, window_bounds = array<i64: 1>}, {transform_indices = @transform_7, window_bounds = array<i64: 8, 128>}]} {
    %c0 = arith.constant 0 : index
    %c0_0 = arith.constant 0 : index
    %c0_1 = arith.constant 0 : index
    %0 = vector.load %arg1[%c0, %c0_0, %c0_1] : memref<8x8x128xf32, #tpu.memory_space<vmem>>, vector<1x8x128xf32>
    %1 = vector.shape_cast %0 : vector<1x8x128xf32> to vector<8x128xf32>
    %c1 = arith.constant 1 : index
    %c0_2 = arith.constant 0 : index
    %c0_3 = arith.constant 0 : index
    %2 = vector.load %arg1[%c1, %c0_2, %c0_3] : memref<8x8x128xf32, #tpu.memory_space<vmem>>, vector<1x8x128xf32>
    %3 = vector.shape_cast %2 : vector<1x8x128xf32> to vector<8x128xf32>
    %c2 = arith.constant 2 : index
    %c0_4 = arith.constant 0 : index
    %c0_5 = arith.constant 0 : index
    %4 = vector.load %arg1[%c2, %c0_4, %c0_5] : memref<8x8x128xf32, #tpu.memory_space<vmem>>, vector<1x8x128xf32>
    %5 = vector.shape_cast %4 : vector<1x8x128xf32> to vector<8x128xf32>
    %c3 = arith.constant 3 : index
    %c0_6 = arith.constant 0 : index
    %c0_7 = arith.constant 0 : index
    %6 = vector.load %arg1[%c3, %c0_6, %c0_7] : memref<8x8x128xf32, #tpu.memory_space<vmem>>, vector<1x8x128xf32>
    %7 = vector.shape_cast %6 : vector<1x8x128xf32> to vector<8x128xf32>
    %c4 = arith.constant 4 : index
    %c0_8 = arith.constant 0 : index
    %c0_9 = arith.constant 0 : index
    %8 = vector.load %arg1[%c4, %c0_8, %c0_9] : memref<8x8x128xf32, #tpu.memory_space<vmem>>, vector<1x8x128xf32>
    %9 = vector.shape_cast %8 : vector<1x8x128xf32> to vector<8x128xf32>
    %c5 = arith.constant 5 : index
    %c0_10 = arith.constant 0 : index
    %c0_11 = arith.constant 0 : index
    %10 = vector.load %arg1[%c5, %c0_10, %c0_11] : memref<8x8x128xf32, #tpu.memory_space<vmem>>, vector<1x8x128xf32>
    %11 = vector.shape_cast %10 : vector<1x8x128xf32> to vector<8x128xf32>
    %c6 = arith.constant 6 : index
    %c0_12 = arith.constant 0 : index
    %c0_13 = arith.constant 0 : index
    %12 = vector.load %arg1[%c6, %c0_12, %c0_13] : memref<8x8x128xf32, #tpu.memory_space<vmem>>, vector<1x8x128xf32>
    %13 = vector.shape_cast %12 : vector<1x8x128xf32> to vector<8x128xf32>
    %c7 = arith.constant 7 : index
    %c0_14 = arith.constant 0 : index
    %c0_15 = arith.constant 0 : index
    %14 = vector.load %arg1[%c7, %c0_14, %c0_15] : memref<8x8x128xf32, #tpu.memory_space<vmem>>, vector<1x8x128xf32>
    %15 = vector.shape_cast %14 : vector<1x8x128xf32> to vector<8x128xf32>
    %c0_16 = arith.constant 0 : index
    %c0_17 = arith.constant 0 : index
    %16 = memref.load %arg2[%c0_16, %c0_17] : memref<6x8xf32, #tpu.memory_space<smem>>
    %17 = vector.broadcast %16 : f32 to vector<8x128xf32>
    %18 = arith.mulf %1, %17 : vector<8x128xf32>
    %c0_18 = arith.constant 0 : index
    %c1_19 = arith.constant 1 : index
    %19 = memref.load %arg2[%c0_18, %c1_19] : memref<6x8xf32, #tpu.memory_space<smem>>
    %20 = vector.broadcast %19 : f32 to vector<8x128xf32>
    %21 = arith.mulf %3, %20 : vector<8x128xf32>
    %22 = arith.addf %18, %21 : vector<8x128xf32>
    %c0_20 = arith.constant 0 : index
    %c2_21 = arith.constant 2 : index
    %23 = memref.load %arg2[%c0_20, %c2_21] : memref<6x8xf32, #tpu.memory_space<smem>>
    %24 = vector.broadcast %23 : f32 to vector<8x128xf32>
    %25 = arith.mulf %5, %24 : vector<8x128xf32>
    %26 = arith.addf %22, %25 : vector<8x128xf32>
    %c0_22 = arith.constant 0 : index
    %c3_23 = arith.constant 3 : index
    %27 = memref.load %arg2[%c0_22, %c3_23] : memref<6x8xf32, #tpu.memory_space<smem>>
    %28 = vector.broadcast %27 : f32 to vector<8x128xf32>
    %29 = arith.mulf %7, %28 : vector<8x128xf32>
    %30 = arith.addf %26, %29 : vector<8x128xf32>
    %c0_24 = arith.constant 0 : index
    %c4_25 = arith.constant 4 : index
    %31 = memref.load %arg2[%c0_24, %c4_25] : memref<6x8xf32, #tpu.memory_space<smem>>
    %32 = vector.broadcast %31 : f32 to vector<8x128xf32>
    %33 = arith.mulf %9, %32 : vector<8x128xf32>
    %34 = arith.addf %30, %33 : vector<8x128xf32>
    %c0_26 = arith.constant 0 : index
    %c5_27 = arith.constant 5 : index
    %35 = memref.load %arg2[%c0_26, %c5_27] : memref<6x8xf32, #tpu.memory_space<smem>>
    %36 = vector.broadcast %35 : f32 to vector<8x128xf32>
    %37 = arith.mulf %11, %36 : vector<8x128xf32>
    %38 = arith.addf %34, %37 : vector<8x128xf32>
    %c0_28 = arith.constant 0 : index
    %c6_29 = arith.constant 6 : index
    %39 = memref.load %arg2[%c0_28, %c6_29] : memref<6x8xf32, #tpu.memory_space<smem>>
    %40 = vector.broadcast %39 : f32 to vector<8x128xf32>
    %41 = arith.mulf %13, %40 : vector<8x128xf32>
    %42 = arith.addf %38, %41 : vector<8x128xf32>
    %c0_30 = arith.constant 0 : index
    %c7_31 = arith.constant 7 : index
    %43 = memref.load %arg2[%c0_30, %c7_31] : memref<6x8xf32, #tpu.memory_space<smem>>
    %44 = vector.broadcast %43 : f32 to vector<8x128xf32>
    %45 = arith.mulf %15, %44 : vector<8x128xf32>
    %46 = arith.addf %42, %45 : vector<8x128xf32>
    %c0_32 = arith.constant 0 : index
    %47 = memref.load %arg3[%c0_32] : memref<6xf32, #tpu.memory_space<smem>>
    %48 = vector.broadcast %47 : f32 to vector<8x128xf32>
    %49 = arith.addf %46, %48 : vector<8x128xf32>
    %50 = math.tanh %49 : vector<8x128xf32>
    %c1_33 = arith.constant 1 : index
    %c0_34 = arith.constant 0 : index
    %51 = memref.load %arg2[%c1_33, %c0_34] : memref<6x8xf32, #tpu.memory_space<smem>>
    %52 = vector.broadcast %51 : f32 to vector<8x128xf32>
    %53 = arith.mulf %1, %52 : vector<8x128xf32>
    %c1_35 = arith.constant 1 : index
    %c1_36 = arith.constant 1 : index
    %54 = memref.load %arg2[%c1_35, %c1_36] : memref<6x8xf32, #tpu.memory_space<smem>>
    %55 = vector.broadcast %54 : f32 to vector<8x128xf32>
    %56 = arith.mulf %3, %55 : vector<8x128xf32>
    %57 = arith.addf %53, %56 : vector<8x128xf32>
    %c1_37 = arith.constant 1 : index
    %c2_38 = arith.constant 2 : index
    %58 = memref.load %arg2[%c1_37, %c2_38] : memref<6x8xf32, #tpu.memory_space<smem>>
    %59 = vector.broadcast %58 : f32 to vector<8x128xf32>
    %60 = arith.mulf %5, %59 : vector<8x128xf32>
    %61 = arith.addf %57, %60 : vector<8x128xf32>
    %c1_39 = arith.constant 1 : index
    %c3_40 = arith.constant 3 : index
    %62 = memref.load %arg2[%c1_39, %c3_40] : memref<6x8xf32, #tpu.memory_space<smem>>
    %63 = vector.broadcast %62 : f32 to vector<8x128xf32>
    %64 = arith.mulf %7, %63 : vector<8x128xf32>
    %65 = arith.addf %61, %64 : vector<8x128xf32>
    %c1_41 = arith.constant 1 : index
    %c4_42 = arith.constant 4 : index
    %66 = memref.load %arg2[%c1_41, %c4_42] : memref<6x8xf32, #tpu.memory_space<smem>>
    %67 = vector.broadcast %66 : f32 to vector<8x128xf32>
    %68 = arith.mulf %9, %67 : vector<8x128xf32>
    %69 = arith.addf %65, %68 : vector<8x128xf32>
    %c1_43 = arith.constant 1 : index
    %c5_44 = arith.constant 5 : index
    %70 = memref.load %arg2[%c1_43, %c5_44] : memref<6x8xf32, #tpu.memory_space<smem>>
    %71 = vector.broadcast %70 : f32 to vector<8x128xf32>
    %72 = arith.mulf %11, %71 : vector<8x128xf32>
    %73 = arith.addf %69, %72 : vector<8x128xf32>
    %c1_45 = arith.constant 1 : index
    %c6_46 = arith.constant 6 : index
    %74 = memref.load %arg2[%c1_45, %c6_46] : memref<6x8xf32, #tpu.memory_space<smem>>
    %75 = vector.broadcast %74 : f32 to vector<8x128xf32>
    %76 = arith.mulf %13, %75 : vector<8x128xf32>
    %77 = arith.addf %73, %76 : vector<8x128xf32>
    %c1_47 = arith.constant 1 : index
    %c7_48 = arith.constant 7 : index
    %78 = memref.load %arg2[%c1_47, %c7_48] : memref<6x8xf32, #tpu.memory_space<smem>>
    %79 = vector.broadcast %78 : f32 to vector<8x128xf32>
    %80 = arith.mulf %15, %79 : vector<8x128xf32>
    %81 = arith.addf %77, %80 : vector<8x128xf32>
    %c1_49 = arith.constant 1 : index
    %82 = memref.load %arg3[%c1_49] : memref<6xf32, #tpu.memory_space<smem>>
    %83 = vector.broadcast %82 : f32 to vector<8x128xf32>
    %84 = arith.addf %81, %83 : vector<8x128xf32>
    %85 = math.tanh %84 : vector<8x128xf32>
    %c2_50 = arith.constant 2 : index
    %c0_51 = arith.constant 0 : index
    %86 = memref.load %arg2[%c2_50, %c0_51] : memref<6x8xf32, #tpu.memory_space<smem>>
    %87 = vector.broadcast %86 : f32 to vector<8x128xf32>
    %88 = arith.mulf %1, %87 : vector<8x128xf32>
    %c2_52 = arith.constant 2 : index
    %c1_53 = arith.constant 1 : index
    %89 = memref.load %arg2[%c2_52, %c1_53] : memref<6x8xf32, #tpu.memory_space<smem>>
    %90 = vector.broadcast %89 : f32 to vector<8x128xf32>
    %91 = arith.mulf %3, %90 : vector<8x128xf32>
    %92 = arith.addf %88, %91 : vector<8x128xf32>
    %c2_54 = arith.constant 2 : index
    %c2_55 = arith.constant 2 : index
    %93 = memref.load %arg2[%c2_54, %c2_55] : memref<6x8xf32, #tpu.memory_space<smem>>
    %94 = vector.broadcast %93 : f32 to vector<8x128xf32>
    %95 = arith.mulf %5, %94 : vector<8x128xf32>
    %96 = arith.addf %92, %95 : vector<8x128xf32>
    %c2_56 = arith.constant 2 : index
    %c3_57 = arith.constant 3 : index
    %97 = memref.load %arg2[%c2_56, %c3_57] : memref<6x8xf32, #tpu.memory_space<smem>>
    %98 = vector.broadcast %97 : f32 to vector<8x128xf32>
    %99 = arith.mulf %7, %98 : vector<8x128xf32>
    %100 = arith.addf %96, %99 : vector<8x128xf32>
    %c2_58 = arith.constant 2 : index
    %c4_59 = arith.constant 4 : index
    %101 = memref.load %arg2[%c2_58, %c4_59] : memref<6x8xf32, #tpu.memory_space<smem>>
    %102 = vector.broadcast %101 : f32 to vector<8x128xf32>
    %103 = arith.mulf %9, %102 : vector<8x128xf32>
    %104 = arith.addf %100, %103 : vector<8x128xf32>
    %c2_60 = arith.constant 2 : index
    %c5_61 = arith.constant 5 : index
    %105 = memref.load %arg2[%c2_60, %c5_61] : memref<6x8xf32, #tpu.memory_space<smem>>
    %106 = vector.broadcast %105 : f32 to vector<8x128xf32>
    %107 = arith.mulf %11, %106 : vector<8x128xf32>
    %108 = arith.addf %104, %107 : vector<8x128xf32>
    %c2_62 = arith.constant 2 : index
    %c6_63 = arith.constant 6 : index
    %109 = memref.load %arg2[%c2_62, %c6_63] : memref<6x8xf32, #tpu.memory_space<smem>>
    %110 = vector.broadcast %109 : f32 to vector<8x128xf32>
    %111 = arith.mulf %13, %110 : vector<8x128xf32>
    %112 = arith.addf %108, %111 : vector<8x128xf32>
    %c2_64 = arith.constant 2 : index
    %c7_65 = arith.constant 7 : index
    %113 = memref.load %arg2[%c2_64, %c7_65] : memref<6x8xf32, #tpu.memory_space<smem>>
    %114 = vector.broadcast %113 : f32 to vector<8x128xf32>
    %115 = arith.mulf %15, %114 : vector<8x128xf32>
    %116 = arith.addf %112, %115 : vector<8x128xf32>
    %c2_66 = arith.constant 2 : index
    %117 = memref.load %arg3[%c2_66] : memref<6xf32, #tpu.memory_space<smem>>
    %118 = vector.broadcast %117 : f32 to vector<8x128xf32>
    %119 = arith.addf %116, %118 : vector<8x128xf32>
    %120 = math.tanh %119 : vector<8x128xf32>
    %c3_67 = arith.constant 3 : index
    %c0_68 = arith.constant 0 : index
    %121 = memref.load %arg2[%c3_67, %c0_68] : memref<6x8xf32, #tpu.memory_space<smem>>
    %122 = vector.broadcast %121 : f32 to vector<8x128xf32>
    %123 = arith.mulf %1, %122 : vector<8x128xf32>
    %c3_69 = arith.constant 3 : index
    %c1_70 = arith.constant 1 : index
    %124 = memref.load %arg2[%c3_69, %c1_70] : memref<6x8xf32, #tpu.memory_space<smem>>
    %125 = vector.broadcast %124 : f32 to vector<8x128xf32>
    %126 = arith.mulf %3, %125 : vector<8x128xf32>
    %127 = arith.addf %123, %126 : vector<8x128xf32>
    %c3_71 = arith.constant 3 : index
    %c2_72 = arith.constant 2 : index
    %128 = memref.load %arg2[%c3_71, %c2_72] : memref<6x8xf32, #tpu.memory_space<smem>>
    %129 = vector.broadcast %128 : f32 to vector<8x128xf32>
    %130 = arith.mulf %5, %129 : vector<8x128xf32>
    %131 = arith.addf %127, %130 : vector<8x128xf32>
    %c3_73 = arith.constant 3 : index
    %c3_74 = arith.constant 3 : index
    %132 = memref.load %arg2[%c3_73, %c3_74] : memref<6x8xf32, #tpu.memory_space<smem>>
    %133 = vector.broadcast %132 : f32 to vector<8x128xf32>
    %134 = arith.mulf %7, %133 : vector<8x128xf32>
    %135 = arith.addf %131, %134 : vector<8x128xf32>
    %c3_75 = arith.constant 3 : index
    %c4_76 = arith.constant 4 : index
    %136 = memref.load %arg2[%c3_75, %c4_76] : memref<6x8xf32, #tpu.memory_space<smem>>
    %137 = vector.broadcast %136 : f32 to vector<8x128xf32>
    %138 = arith.mulf %9, %137 : vector<8x128xf32>
    %139 = arith.addf %135, %138 : vector<8x128xf32>
    %c3_77 = arith.constant 3 : index
    %c5_78 = arith.constant 5 : index
    %140 = memref.load %arg2[%c3_77, %c5_78] : memref<6x8xf32, #tpu.memory_space<smem>>
    %141 = vector.broadcast %140 : f32 to vector<8x128xf32>
    %142 = arith.mulf %11, %141 : vector<8x128xf32>
    %143 = arith.addf %139, %142 : vector<8x128xf32>
    %c3_79 = arith.constant 3 : index
    %c6_80 = arith.constant 6 : index
    %144 = memref.load %arg2[%c3_79, %c6_80] : memref<6x8xf32, #tpu.memory_space<smem>>
    %145 = vector.broadcast %144 : f32 to vector<8x128xf32>
    %146 = arith.mulf %13, %145 : vector<8x128xf32>
    %147 = arith.addf %143, %146 : vector<8x128xf32>
    %c3_81 = arith.constant 3 : index
    %c7_82 = arith.constant 7 : index
    %148 = memref.load %arg2[%c3_81, %c7_82] : memref<6x8xf32, #tpu.memory_space<smem>>
    %149 = vector.broadcast %148 : f32 to vector<8x128xf32>
    %150 = arith.mulf %15, %149 : vector<8x128xf32>
    %151 = arith.addf %147, %150 : vector<8x128xf32>
    %c3_83 = arith.constant 3 : index
    %152 = memref.load %arg3[%c3_83] : memref<6xf32, #tpu.memory_space<smem>>
    %153 = vector.broadcast %152 : f32 to vector<8x128xf32>
    %154 = arith.addf %151, %153 : vector<8x128xf32>
    %155 = math.tanh %154 : vector<8x128xf32>
    %c4_84 = arith.constant 4 : index
    %c0_85 = arith.constant 0 : index
    %156 = memref.load %arg2[%c4_84, %c0_85] : memref<6x8xf32, #tpu.memory_space<smem>>
    %157 = vector.broadcast %156 : f32 to vector<8x128xf32>
    %158 = arith.mulf %1, %157 : vector<8x128xf32>
    %c4_86 = arith.constant 4 : index
    %c1_87 = arith.constant 1 : index
    %159 = memref.load %arg2[%c4_86, %c1_87] : memref<6x8xf32, #tpu.memory_space<smem>>
    %160 = vector.broadcast %159 : f32 to vector<8x128xf32>
    %161 = arith.mulf %3, %160 : vector<8x128xf32>
    %162 = arith.addf %158, %161 : vector<8x128xf32>
    %c4_88 = arith.constant 4 : index
    %c2_89 = arith.constant 2 : index
    %163 = memref.load %arg2[%c4_88, %c2_89] : memref<6x8xf32, #tpu.memory_space<smem>>
    %164 = vector.broadcast %163 : f32 to vector<8x128xf32>
    %165 = arith.mulf %5, %164 : vector<8x128xf32>
    %166 = arith.addf %162, %165 : vector<8x128xf32>
    %c4_90 = arith.constant 4 : index
    %c3_91 = arith.constant 3 : index
    %167 = memref.load %arg2[%c4_90, %c3_91] : memref<6x8xf32, #tpu.memory_space<smem>>
    %168 = vector.broadcast %167 : f32 to vector<8x128xf32>
    %169 = arith.mulf %7, %168 : vector<8x128xf32>
    %170 = arith.addf %166, %169 : vector<8x128xf32>
    %c4_92 = arith.constant 4 : index
    %c4_93 = arith.constant 4 : index
    %171 = memref.load %arg2[%c4_92, %c4_93] : memref<6x8xf32, #tpu.memory_space<smem>>
    %172 = vector.broadcast %171 : f32 to vector<8x128xf32>
    %173 = arith.mulf %9, %172 : vector<8x128xf32>
    %174 = arith.addf %170, %173 : vector<8x128xf32>
    %c4_94 = arith.constant 4 : index
    %c5_95 = arith.constant 5 : index
    %175 = memref.load %arg2[%c4_94, %c5_95] : memref<6x8xf32, #tpu.memory_space<smem>>
    %176 = vector.broadcast %175 : f32 to vector<8x128xf32>
    %177 = arith.mulf %11, %176 : vector<8x128xf32>
    %178 = arith.addf %174, %177 : vector<8x128xf32>
    %c4_96 = arith.constant 4 : index
    %c6_97 = arith.constant 6 : index
    %179 = memref.load %arg2[%c4_96, %c6_97] : memref<6x8xf32, #tpu.memory_space<smem>>
    %180 = vector.broadcast %179 : f32 to vector<8x128xf32>
    %181 = arith.mulf %13, %180 : vector<8x128xf32>
    %182 = arith.addf %178, %181 : vector<8x128xf32>
    %c4_98 = arith.constant 4 : index
    %c7_99 = arith.constant 7 : index
    %183 = memref.load %arg2[%c4_98, %c7_99] : memref<6x8xf32, #tpu.memory_space<smem>>
    %184 = vector.broadcast %183 : f32 to vector<8x128xf32>
    %185 = arith.mulf %15, %184 : vector<8x128xf32>
    %186 = arith.addf %182, %185 : vector<8x128xf32>
    %c4_100 = arith.constant 4 : index
    %187 = memref.load %arg3[%c4_100] : memref<6xf32, #tpu.memory_space<smem>>
    %188 = vector.broadcast %187 : f32 to vector<8x128xf32>
    %189 = arith.addf %186, %188 : vector<8x128xf32>
    %190 = math.tanh %189 : vector<8x128xf32>
    %c5_101 = arith.constant 5 : index
    %c0_102 = arith.constant 0 : index
    %191 = memref.load %arg2[%c5_101, %c0_102] : memref<6x8xf32, #tpu.memory_space<smem>>
    %192 = vector.broadcast %191 : f32 to vector<8x128xf32>
    %193 = arith.mulf %1, %192 : vector<8x128xf32>
    %c5_103 = arith.constant 5 : index
    %c1_104 = arith.constant 1 : index
    %194 = memref.load %arg2[%c5_103, %c1_104] : memref<6x8xf32, #tpu.memory_space<smem>>
    %195 = vector.broadcast %194 : f32 to vector<8x128xf32>
    %196 = arith.mulf %3, %195 : vector<8x128xf32>
    %197 = arith.addf %193, %196 : vector<8x128xf32>
    %c5_105 = arith.constant 5 : index
    %c2_106 = arith.constant 2 : index
    %198 = memref.load %arg2[%c5_105, %c2_106] : memref<6x8xf32, #tpu.memory_space<smem>>
    %199 = vector.broadcast %198 : f32 to vector<8x128xf32>
    %200 = arith.mulf %5, %199 : vector<8x128xf32>
    %201 = arith.addf %197, %200 : vector<8x128xf32>
    %c5_107 = arith.constant 5 : index
    %c3_108 = arith.constant 3 : index
    %202 = memref.load %arg2[%c5_107, %c3_108] : memref<6x8xf32, #tpu.memory_space<smem>>
    %203 = vector.broadcast %202 : f32 to vector<8x128xf32>
    %204 = arith.mulf %7, %203 : vector<8x128xf32>
    %205 = arith.addf %201, %204 : vector<8x128xf32>
    %c5_109 = arith.constant 5 : index
    %c4_110 = arith.constant 4 : index
    %206 = memref.load %arg2[%c5_109, %c4_110] : memref<6x8xf32, #tpu.memory_space<smem>>
    %207 = vector.broadcast %206 : f32 to vector<8x128xf32>
    %208 = arith.mulf %9, %207 : vector<8x128xf32>
    %209 = arith.addf %205, %208 : vector<8x128xf32>
    %c5_111 = arith.constant 5 : index
    %c5_112 = arith.constant 5 : index
    %210 = memref.load %arg2[%c5_111, %c5_112] : memref<6x8xf32, #tpu.memory_space<smem>>
    %211 = vector.broadcast %210 : f32 to vector<8x128xf32>
    %212 = arith.mulf %11, %211 : vector<8x128xf32>
    %213 = arith.addf %209, %212 : vector<8x128xf32>
    %c5_113 = arith.constant 5 : index
    %c6_114 = arith.constant 6 : index
    %214 = memref.load %arg2[%c5_113, %c6_114] : memref<6x8xf32, #tpu.memory_space<smem>>
    %215 = vector.broadcast %214 : f32 to vector<8x128xf32>
    %216 = arith.mulf %13, %215 : vector<8x128xf32>
    %217 = arith.addf %213, %216 : vector<8x128xf32>
    %c5_115 = arith.constant 5 : index
    %c7_116 = arith.constant 7 : index
    %218 = memref.load %arg2[%c5_115, %c7_116] : memref<6x8xf32, #tpu.memory_space<smem>>
    %219 = vector.broadcast %218 : f32 to vector<8x128xf32>
    %220 = arith.mulf %15, %219 : vector<8x128xf32>
    %221 = arith.addf %217, %220 : vector<8x128xf32>
    %c5_117 = arith.constant 5 : index
    %222 = memref.load %arg3[%c5_117] : memref<6xf32, #tpu.memory_space<smem>>
    %223 = vector.broadcast %222 : f32 to vector<8x128xf32>
    %224 = arith.addf %221, %223 : vector<8x128xf32>
    %225 = math.tanh %224 : vector<8x128xf32>
    %c0_118 = arith.constant 0 : index
    %c0_119 = arith.constant 0 : index
    %226 = memref.load %arg4[%c0_118, %c0_119] : memref<4x6xf32, #tpu.memory_space<smem>>
    %227 = vector.broadcast %226 : f32 to vector<8x128xf32>
    %228 = arith.mulf %50, %227 : vector<8x128xf32>
    %c0_120 = arith.constant 0 : index
    %c1_121 = arith.constant 1 : index
    %229 = memref.load %arg4[%c0_120, %c1_121] : memref<4x6xf32, #tpu.memory_space<smem>>
    %230 = vector.broadcast %229 : f32 to vector<8x128xf32>
    %231 = arith.mulf %85, %230 : vector<8x128xf32>
    %232 = arith.addf %228, %231 : vector<8x128xf32>
    %c0_122 = arith.constant 0 : index
    %c2_123 = arith.constant 2 : index
    %233 = memref.load %arg4[%c0_122, %c2_123] : memref<4x6xf32, #tpu.memory_space<smem>>
    %234 = vector.broadcast %233 : f32 to vector<8x128xf32>
    %235 = arith.mulf %120, %234 : vector<8x128xf32>
    %236 = arith.addf %232, %235 : vector<8x128xf32>
    %c0_124 = arith.constant 0 : index
    %c3_125 = arith.constant 3 : index
    %237 = memref.load %arg4[%c0_124, %c3_125] : memref<4x6xf32, #tpu.memory_space<smem>>
    %238 = vector.broadcast %237 : f32 to vector<8x128xf32>
    %239 = arith.mulf %155, %238 : vector<8x128xf32>
    %240 = arith.addf %236, %239 : vector<8x128xf32>
    %c0_126 = arith.constant 0 : index
    %c4_127 = arith.constant 4 : index
    %241 = memref.load %arg4[%c0_126, %c4_127] : memref<4x6xf32, #tpu.memory_space<smem>>
    %242 = vector.broadcast %241 : f32 to vector<8x128xf32>
    %243 = arith.mulf %190, %242 : vector<8x128xf32>
    %244 = arith.addf %240, %243 : vector<8x128xf32>
    %c0_128 = arith.constant 0 : index
    %c5_129 = arith.constant 5 : index
    %245 = memref.load %arg4[%c0_128, %c5_129] : memref<4x6xf32, #tpu.memory_space<smem>>
    %246 = vector.broadcast %245 : f32 to vector<8x128xf32>
    %247 = arith.mulf %225, %246 : vector<8x128xf32>
    %248 = arith.addf %244, %247 : vector<8x128xf32>
    %c0_130 = arith.constant 0 : index
    %249 = memref.load %arg5[%c0_130] : memref<4xf32, #tpu.memory_space<smem>>
    %250 = vector.broadcast %249 : f32 to vector<8x128xf32>
    %251 = arith.addf %248, %250 : vector<8x128xf32>
    %252 = math.tanh %251 : vector<8x128xf32>
    %c1_131 = arith.constant 1 : index
    %c0_132 = arith.constant 0 : index
    %253 = memref.load %arg4[%c1_131, %c0_132] : memref<4x6xf32, #tpu.memory_space<smem>>
    %254 = vector.broadcast %253 : f32 to vector<8x128xf32>
    %255 = arith.mulf %50, %254 : vector<8x128xf32>
    %c1_133 = arith.constant 1 : index
    %c1_134 = arith.constant 1 : index
    %256 = memref.load %arg4[%c1_133, %c1_134] : memref<4x6xf32, #tpu.memory_space<smem>>
    %257 = vector.broadcast %256 : f32 to vector<8x128xf32>
    %258 = arith.mulf %85, %257 : vector<8x128xf32>
    %259 = arith.addf %255, %258 : vector<8x128xf32>
    %c1_135 = arith.constant 1 : index
    %c2_136 = arith.constant 2 : index
    %260 = memref.load %arg4[%c1_135, %c2_136] : memref<4x6xf32, #tpu.memory_space<smem>>
    %261 = vector.broadcast %260 : f32 to vector<8x128xf32>
    %262 = arith.mulf %120, %261 : vector<8x128xf32>
    %263 = arith.addf %259, %262 : vector<8x128xf32>
    %c1_137 = arith.constant 1 : index
    %c3_138 = arith.constant 3 : index
    %264 = memref.load %arg4[%c1_137, %c3_138] : memref<4x6xf32, #tpu.memory_space<smem>>
    %265 = vector.broadcast %264 : f32 to vector<8x128xf32>
    %266 = arith.mulf %155, %265 : vector<8x128xf32>
    %267 = arith.addf %263, %266 : vector<8x128xf32>
    %c1_139 = arith.constant 1 : index
    %c4_140 = arith.constant 4 : index
    %268 = memref.load %arg4[%c1_139, %c4_140] : memref<4x6xf32, #tpu.memory_space<smem>>
    %269 = vector.broadcast %268 : f32 to vector<8x128xf32>
    %270 = arith.mulf %190, %269 : vector<8x128xf32>
    %271 = arith.addf %267, %270 : vector<8x128xf32>
    %c1_141 = arith.constant 1 : index
    %c5_142 = arith.constant 5 : index
    %272 = memref.load %arg4[%c1_141, %c5_142] : memref<4x6xf32, #tpu.memory_space<smem>>
    %273 = vector.broadcast %272 : f32 to vector<8x128xf32>
    %274 = arith.mulf %225, %273 : vector<8x128xf32>
    %275 = arith.addf %271, %274 : vector<8x128xf32>
    %c1_143 = arith.constant 1 : index
    %276 = memref.load %arg5[%c1_143] : memref<4xf32, #tpu.memory_space<smem>>
    %277 = vector.broadcast %276 : f32 to vector<8x128xf32>
    %278 = arith.addf %275, %277 : vector<8x128xf32>
    %279 = math.tanh %278 : vector<8x128xf32>
    %c2_144 = arith.constant 2 : index
    %c0_145 = arith.constant 0 : index
    %280 = memref.load %arg4[%c2_144, %c0_145] : memref<4x6xf32, #tpu.memory_space<smem>>
    %281 = vector.broadcast %280 : f32 to vector<8x128xf32>
    %282 = arith.mulf %50, %281 : vector<8x128xf32>
    %c2_146 = arith.constant 2 : index
    %c1_147 = arith.constant 1 : index
    %283 = memref.load %arg4[%c2_146, %c1_147] : memref<4x6xf32, #tpu.memory_space<smem>>
    %284 = vector.broadcast %283 : f32 to vector<8x128xf32>
    %285 = arith.mulf %85, %284 : vector<8x128xf32>
    %286 = arith.addf %282, %285 : vector<8x128xf32>
    %c2_148 = arith.constant 2 : index
    %c2_149 = arith.constant 2 : index
    %287 = memref.load %arg4[%c2_148, %c2_149] : memref<4x6xf32, #tpu.memory_space<smem>>
    %288 = vector.broadcast %287 : f32 to vector<8x128xf32>
    %289 = arith.mulf %120, %288 : vector<8x128xf32>
    %290 = arith.addf %286, %289 : vector<8x128xf32>
    %c2_150 = arith.constant 2 : index
    %c3_151 = arith.constant 3 : index
    %291 = memref.load %arg4[%c2_150, %c3_151] : memref<4x6xf32, #tpu.memory_space<smem>>
    %292 = vector.broadcast %291 : f32 to vector<8x128xf32>
    %293 = arith.mulf %155, %292 : vector<8x128xf32>
    %294 = arith.addf %290, %293 : vector<8x128xf32>
    %c2_152 = arith.constant 2 : index
    %c4_153 = arith.constant 4 : index
    %295 = memref.load %arg4[%c2_152, %c4_153] : memref<4x6xf32, #tpu.memory_space<smem>>
    %296 = vector.broadcast %295 : f32 to vector<8x128xf32>
    %297 = arith.mulf %190, %296 : vector<8x128xf32>
    %298 = arith.addf %294, %297 : vector<8x128xf32>
    %c2_154 = arith.constant 2 : index
    %c5_155 = arith.constant 5 : index
    %299 = memref.load %arg4[%c2_154, %c5_155] : memref<4x6xf32, #tpu.memory_space<smem>>
    %300 = vector.broadcast %299 : f32 to vector<8x128xf32>
    %301 = arith.mulf %225, %300 : vector<8x128xf32>
    %302 = arith.addf %298, %301 : vector<8x128xf32>
    %c2_156 = arith.constant 2 : index
    %303 = memref.load %arg5[%c2_156] : memref<4xf32, #tpu.memory_space<smem>>
    %304 = vector.broadcast %303 : f32 to vector<8x128xf32>
    %305 = arith.addf %302, %304 : vector<8x128xf32>
    %306 = math.tanh %305 : vector<8x128xf32>
    %c3_157 = arith.constant 3 : index
    %c0_158 = arith.constant 0 : index
    %307 = memref.load %arg4[%c3_157, %c0_158] : memref<4x6xf32, #tpu.memory_space<smem>>
    %308 = vector.broadcast %307 : f32 to vector<8x128xf32>
    %309 = arith.mulf %50, %308 : vector<8x128xf32>
    %c3_159 = arith.constant 3 : index
    %c1_160 = arith.constant 1 : index
    %310 = memref.load %arg4[%c3_159, %c1_160] : memref<4x6xf32, #tpu.memory_space<smem>>
    %311 = vector.broadcast %310 : f32 to vector<8x128xf32>
    %312 = arith.mulf %85, %311 : vector<8x128xf32>
    %313 = arith.addf %309, %312 : vector<8x128xf32>
    %c3_161 = arith.constant 3 : index
    %c2_162 = arith.constant 2 : index
    %314 = memref.load %arg4[%c3_161, %c2_162] : memref<4x6xf32, #tpu.memory_space<smem>>
    %315 = vector.broadcast %314 : f32 to vector<8x128xf32>
    %316 = arith.mulf %120, %315 : vector<8x128xf32>
    %317 = arith.addf %313, %316 : vector<8x128xf32>
    %c3_163 = arith.constant 3 : index
    %c3_164 = arith.constant 3 : index
    %318 = memref.load %arg4[%c3_163, %c3_164] : memref<4x6xf32, #tpu.memory_space<smem>>
    %319 = vector.broadcast %318 : f32 to vector<8x128xf32>
    %320 = arith.mulf %155, %319 : vector<8x128xf32>
    %321 = arith.addf %317, %320 : vector<8x128xf32>
    %c3_165 = arith.constant 3 : index
    %c4_166 = arith.constant 4 : index
    %322 = memref.load %arg4[%c3_165, %c4_166] : memref<4x6xf32, #tpu.memory_space<smem>>
    %323 = vector.broadcast %322 : f32 to vector<8x128xf32>
    %324 = arith.mulf %190, %323 : vector<8x128xf32>
    %325 = arith.addf %321, %324 : vector<8x128xf32>
    %c3_167 = arith.constant 3 : index
    %c5_168 = arith.constant 5 : index
    %326 = memref.load %arg4[%c3_167, %c5_168] : memref<4x6xf32, #tpu.memory_space<smem>>
    %327 = vector.broadcast %326 : f32 to vector<8x128xf32>
    %328 = arith.mulf %225, %327 : vector<8x128xf32>
    %329 = arith.addf %325, %328 : vector<8x128xf32>
    %c3_169 = arith.constant 3 : index
    %330 = memref.load %arg5[%c3_169] : memref<4xf32, #tpu.memory_space<smem>>
    %331 = vector.broadcast %330 : f32 to vector<8x128xf32>
    %332 = arith.addf %329, %331 : vector<8x128xf32>
    %333 = math.tanh %332 : vector<8x128xf32>
    %c0_170 = arith.constant 0 : index
    %c0_171 = arith.constant 0 : index
    %334 = memref.load %arg6[%c0_170, %c0_171] : memref<1x4xf32, #tpu.memory_space<smem>>
    %335 = vector.broadcast %334 : f32 to vector<8x128xf32>
    %336 = arith.mulf %252, %335 : vector<8x128xf32>
    %c0_172 = arith.constant 0 : index
    %c1_173 = arith.constant 1 : index
    %337 = memref.load %arg6[%c0_172, %c1_173] : memref<1x4xf32, #tpu.memory_space<smem>>
    %338 = vector.broadcast %337 : f32 to vector<8x128xf32>
    %339 = arith.mulf %279, %338 : vector<8x128xf32>
    %340 = arith.addf %336, %339 : vector<8x128xf32>
    %c0_174 = arith.constant 0 : index
    %c2_175 = arith.constant 2 : index
    %341 = memref.load %arg6[%c0_174, %c2_175] : memref<1x4xf32, #tpu.memory_space<smem>>
    %342 = vector.broadcast %341 : f32 to vector<8x128xf32>
    %343 = arith.mulf %306, %342 : vector<8x128xf32>
    %344 = arith.addf %340, %343 : vector<8x128xf32>
    %c0_176 = arith.constant 0 : index
    %c3_177 = arith.constant 3 : index
    %345 = memref.load %arg6[%c0_176, %c3_177] : memref<1x4xf32, #tpu.memory_space<smem>>
    %346 = vector.broadcast %345 : f32 to vector<8x128xf32>
    %347 = arith.mulf %333, %346 : vector<8x128xf32>
    %348 = arith.addf %344, %347 : vector<8x128xf32>
    %c0_178 = arith.constant 0 : index
    %349 = memref.load %arg7[%c0_178] : memref<1xf32, #tpu.memory_space<smem>>
    %350 = vector.broadcast %349 : f32 to vector<8x128xf32>
    %351 = arith.addf %348, %350 : vector<8x128xf32>
    %352 = math.tanh %351 : vector<8x128xf32>
    %cst = arith.constant 5.000000e-01 : f32
    %353 = vector.broadcast %cst : f32 to vector<8x128xf32>
    %354 = arith.mulf %353, %352 : vector<8x128xf32>
    %cst_179 = arith.constant 5.000000e-01 : f32
    %355 = vector.broadcast %cst_179 : f32 to vector<8x128xf32>
    %356 = arith.addf %354, %355 : vector<8x128xf32>
    %c0_180 = arith.constant 0 : index
    %c0_181 = arith.constant 0 : index
    %357 = vector.load %arg8[%c0_180, %c0_181] : memref<8x128xf32, #tpu.memory_space<vmem>>, vector<8x128xf32>
    tpu.vector_store %arg8[%c0_180, %c0_181], %356 {strides = array<i32>} : memref<8x128xf32, #tpu.memory_space<vmem>>, vector<8x128xf32>,
    return
  }
  func.func @transform_0(%arg0: i32) -> (i32, i32, i32) {
    %c0_i32 = arith.constant 0 : i32
    %c0_i32_0 = arith.constant 0 : i32
    %c0_i32_1 = arith.constant 0 : i32
    return %c0_i32, %arg0, %c0_i32_0 : i32, i32, i32
  }
  func.func @transform_1(%arg0: i32) -> (i32, i32) {
    %c0_i32 = arith.constant 0 : i32
    %c0_i32_0 = arith.constant 0 : i32
    %c0_i32_1 = arith.constant 0 : i32
    return %c0_i32, %c0_i32_0 : i32, i32
  }
  func.func @transform_2(%arg0: i32) -> i32 {
    %c0_i32 = arith.constant 0 : i32
    %c0_i32_0 = arith.constant 0 : i32
    return %c0_i32 : i32
  }
  func.func @transform_3(%arg0: i32) -> (i32, i32) {
    %c0_i32 = arith.constant 0 : i32
    %c0_i32_0 = arith.constant 0 : i32
    %c0_i32_1 = arith.constant 0 : i32
    return %c0_i32, %c0_i32_0 : i32, i32
  }
  func.func @transform_4(%arg0: i32) -> i32 {
    %c0_i32 = arith.constant 0 : i32
    %c0_i32_0 = arith.constant 0 : i32
    return %c0_i32 : i32
  }
  func.func @transform_5(%arg0: i32) -> (i32, i32) {
    %c0_i32 = arith.constant 0 : i32
    %c0_i32_0 = arith.constant 0 : i32
    %c0_i32_1 = arith.constant 0 : i32
    return %c0_i32, %c0_i32_0 : i32, i32
  }
  func.func @transform_6(%arg0: i32) -> i32 {
    %c0_i32 = arith.constant 0 : i32
    %c0_i32_0 = arith.constant 0 : i32
    return %c0_i32 : i32
  }
  func.func @transform_7(%arg0: i32) -> (i32, i32) {
    %c0_i32 = arith.constant 0 : i32
    %c0_i32_0 = arith.constant 0 : i32
    return %arg0, %c0_i32 : i32, i32
  }
}

</mosaic_0001>

<bundles_post_ra>
// kernel: tpu_custom_call.1
= control target key start
LH: loop header
LB: loop body
LE: loop exit
PB: predicated region body
PF: predicated region fallthrough
CT: control target
= control target key end

     0   :  { %13 = vsyncpa [#allocation4], 0  ;;  %s1008_s0 = inlined_call_operand.hbm [shape: f32[8,8,128], index: 0, kind: input, shape index: {}]   ;;  %s1009_s1 = inlined_call_operand.hbm [shape: f32[6,8], index: 1, kind: input, shape index: {}]   ;;  %s1010_s2 = inlined_call_operand.hbm [shape: f32[6], index: 2, kind: input, shape index: {}]   ;;  %s1011_s3 = inlined_call_operand.vmem [shape: f32[4,6], index: 3, kind: input, shape index: {}]   ;;  %s1012_s4 = inlined_call_operand.vmem [shape: f32[4], index: 4, kind: input, shape index: {}]   ;;  %s1013_s5 = inlined_call_operand.vmem [shape: f32[1,4], index: 5, kind: input, shape index: {}]   ;;  %s1014_s6 = inlined_call_operand.<no memory space> [shape: f32[1], index: 6, kind: input, shape index: {}]   ;;  %s1015_s7 = inlined_call_operand.hbm [shape: f32[8,128], index: 7, kind: output, shape index: {}]  }
   0x1   :  { %14 = vsyncpa [#allocation6], 0 }
   0x2   :  { %15 = vsyncpa [#allocation10], 0 }
   0x3   :  { %16 = vsyncpa [#allocation7], 0 }
   0x4   :  { %17 = vsyncpa [#allocation13], 0  ;;  %s64_s26 = sshll.u32 %s1012_s4, 4  ;;  %s65_s26 = int_to_ptr.vmem [resolvable:$true] %s64_s26 }
   0x5   :  { %18 = vsyncpa [#allocation5], 0  ;;  %s23_s29 = sshll.u32 %s1008_s0, 4  ;;  %s712_s30 = smov [#allocation12]   ;;  %s24_s29 = int_to_ptr.hbm [resolvable:$true] %s23_s29 }
   0x6   :  { %67 = dma.vmem_to_smem %s65_s26, 16, %s712_s30, [#allocation13]  }
   0x7   :  { %s713_s8 = smov [#allocation3]   ;;  %s714_s10 = smov 128  }
   0x8   :  { %s25_s9 = sshll.u32 %s713_s8, 4  ;;  %s715_s11 = smov 8   ;;  %s26_s9 = int_to_ptr.vmem [resolvable:$true] %s25_s9 }
   0x9   :  { %31 = dma.hbm_to_vmem [thread:$0]  %s24_s29, 1024, %s26_s9, [#allocation4], %s714_s10, %s714_s10, %s715_s11  }
   0xa   :  { %s37_s14 = sshll.u32 %s1009_s1, 4  ;;  %s46_s16 = sshll.u32 %s1010_s2, 4  ;;  %s38_s14 = int_to_ptr.hbm [resolvable:$true] %s37_s14  ;;  %s47_s16 = int_to_ptr.hbm [resolvable:$true] %s46_s16 }
   0xb   :  { %s716_s17 = smov [#allocation8]   ;;  %s717_s0 = smov [#allocation9]  }
   0xc   :  { %40 = dma.hbm_to_smem %s38_s14, 128, %s716_s17, [#allocation6]  }
   0xd   :  { %49 = dma.hbm_to_smem %s47_s16, 16, %s717_s0, [#allocation10]  }
   0xe   :  { %s55_s20 = sshll.u32 %s1011_s3, 4  ;;  %s73_s23 = sshll.u32 %s1013_s5, 4  ;;  %s56_s20 = int_to_ptr.vmem [resolvable:$true] %s55_s20  ;;  %s74_s23 = int_to_ptr.vmem [resolvable:$true] %s73_s23 }
   0xf   :  { %s718_s1 = smov [#allocation11]   ;;  %s719_s24 = smov [#allocation14]  }
  0x10   :  { %58 = dma.vmem_to_smem %s56_s20, 64, %s718_s1, [#allocation7]  }
  0x11   :  { %76 = dma.vmem_to_smem %s74_s23, 16, %s719_s24, [#allocation13]  }
  0x12   :  { %700 = dma.done.wait [#allocation4], 1024  }
  0x13   :  { %701 = vsyncadd [#allocation4], 4294966272 }
  0x14   :  { %702 = dma.done.wait [#allocation6], 128  }
  0x15   :  { %703 = vsyncadd [#allocation6], 4294967168 }
  0x16   :  { %704 = dma.done.wait [#allocation10], 16  }
  0x17   :  { %705 = vsyncadd [#allocation10], 4294967280 }
  0x18   :  { %706 = dma.done.wait [#allocation7], 64  }
  0x19   :  { %707 = vsyncadd [#allocation7], 4294967232 }
  0x1a   :  { %708 = dma.done.wait [#allocation13], 32  }
  0x1b   :  { %709 = vsyncadd [#allocation13], 4294967264 }
  0x1c   :  { %103 = sfence }
  0x1d   :  { %s119_s2 = sld [smem:[#allocation8]]  ;;  %v781_v0 = vld [vmem:[#allocation3] sm:$0xff]  ;;  %v783_v1 = vld [vmem:[#allocation3 + $0x8] sm:$0xff]  ;;  %v795_v6 = vld [vmem:[#allocation3 + $0x10] sm:$0xff] }
  0x1e   :  { %s480_s3 = sld [smem:[#allocation8 + $0x1]]  ;;  %v798_v10 = vld [vmem:[#allocation3 + $0x18] sm:$0xff]  ;;  %v810_v17 = vld [vmem:[#allocation3 + $0x20] sm:$0xff]  ;;  %v818_v26 = vld [vmem:[#allocation3 + $0x28] sm:$0xff] }
  0x1f   :  { %s481_s25 = sld [smem:[#allocation8 + $0x2]]  ;;  %v827_v31 = vld [vmem:[#allocation3 + $0x30] sm:$0xff]  ;;  %v845_v50 = vld [vmem:[#allocation3 + $0x38] sm:$0xff] }
  0x20   :  { %s482_s5 = sld [smem:[#allocation8 + $0x3]] }
  0x21   :  { %s779_s26 = sld [smem:[#allocation8 + $0x4]] }
  0x22   :  { %s785_s27 = sld [smem:[#allocation8 + $0x5]] }
  0x23   :  { %v120_v2 = vstv %s119_s2  ;;  %s787_s28 = sld [smem:[#allocation8 + $0x6]] }
  0x24   :  { %v123_v3 = vstv %s480_s3  ;;  %s789_s29 = sld [smem:[#allocation8 + $0x7]]  ;;  %v121_v4 = vmul.f32 %v120_v2, %v781_v0 }
  0x25   :  { %v124_v5 = vmul.f32 %v123_v3, %v783_v1  ;;  %s793_s30 = sld [smem:[#allocation9]]  ;;  %v127_v7 = vstv %s481_s25 }
  0x26   :  { %s487_s8 = sld [smem:[#allocation8 + $0x80]]  ;;  %v128_v9 = vmul.f32 %v127_v7, %v795_v6  ;;  %v131_v11 = vstv %s482_s5 }
  0x27   :  { %s488_s9 = sld [smem:[#allocation8 + $0x81]]  ;;  %v125_v8 = vadd.f32 %v124_v5, %v121_v4  ;;  %v132_v14 = vmul.f32 %v131_v11, %v798_v10  ;;  %v135_v18 = vstv %s779_s26 }
  0x28   :  { %s489_s10 = sld [smem:[#allocation8 + $0x82]]  ;;  %v136_v25 = vmul.f32 %v135_v18, %v810_v17  ;;  %v139_v27 = vstv %s785_s27 }
  0x29   :  { %s490_s11 = sld [smem:[#allocation8 + $0x83]]  ;;  %v129_v13 = vadd.f32 %v128_v9, %v125_v8  ;;  %v140_v33 = vmul.f32 %v139_v27, %v818_v26  ;;  %v143_v34 = vstv %s787_s28 }
  0x2a   :  { %s800_s12 = sld [smem:[#allocation8 + $0x84]]  ;;  %v144_v43 = vmul.f32 %v143_v34, %v827_v31  ;;  %v147_v51 = vstv %s789_s29 }
  0x2b   :  { %s802_s13 = sld [smem:[#allocation8 + $0x85]]  ;;  %v133_v24 = vadd.f32 %v132_v14, %v129_v13  ;;  %v148_v59 = vmul.f32 %v147_v51, %v845_v50 }
  0x2c   :  { %v155_v12 = vstv %s487_s8  ;;  %s804_s14 = sld [smem:[#allocation8 + $0x86]] }
  0x2d   :  { %v156_v15 = vmul.f32 %v155_v12, %v781_v0  ;;  %v158_v16 = vstv %s488_s9  ;;  %s808_s4 = sld [smem:[#allocation8 + $0x87]]  ;;  %v137_v32 = vadd.f32 %v136_v25, %v133_v24  ;;  %v151_v25 = vstv %s793_s30 }
  0x2e   :  { %v159_v19 = vmul.f32 %v158_v16, %v783_v1  ;;  %v162_v20 = vstv %s489_s10  ;;  %s814_s15 = sld [smem:[#allocation9 + $0x1]] }
  0x2f   :  { %v163_v21 = vmul.f32 %v162_v20, %v795_v6  ;;  %s496_s16 = sld [smem:[#allocation8 + $0x100]]  ;;  %v166_v23 = vstv %s490_s11  ;;  %v141_v46 = vadd.f32 %v140_v33, %v137_v32 }
  0x30   :  { %v160_v22 = vadd.f32 %v159_v19, %v156_v15  ;;  %s497_s17 = sld [smem:[#allocation8 + $0x101]]  ;;  %v167_v29 = vmul.f32 %v166_v23, %v798_v10  ;;  %v170_v30 = vstv %s800_s12 }
  0x31   :  { %s498_s0 = sld [smem:[#allocation8 + $0x102]]  ;;  %v171_v36 = vmul.f32 %v170_v30, %v810_v17  ;;  %v174_v40 = vstv %s802_s13  ;;  %v145_v58 = vadd.f32 %v144_v43, %v141_v46 }
  0x32   :  { %s499_s18 = sld [smem:[#allocation8 + $0x103]]  ;;  %v164_v28 = vadd.f32 %v163_v21, %v160_v22  ;;  %v175_v52 = vmul.f32 %v174_v40, %v818_v26  ;;  %v178_v53 = vstv %s804_s14 }
  0x33   :  { %s823_s19 = sld [smem:[#allocation8 + $0x104]]  ;;  %v179_v61 = vmul.f32 %v178_v53, %v827_v31  ;;  %v182_v8 = vstv %s808_s4  ;;  %v149_v12 = vadd.f32 %v148_v59, %v145_v58 }
  0x34   :  { %s825_s20 = sld [smem:[#allocation8 + $0x105]]  ;;  %v168_v39 = vadd.f32 %v167_v29, %v164_v28  ;;  %v183_v22 = vmul.f32 %v182_v8, %v845_v50 }
  0x35   :  { %v190_v35 = vstv %s496_s16  ;;  %s831_s21 = sld [smem:[#allocation8 + $0x106]] }
  0x36   :  { %v191_v37 = vmul.f32 %v190_v35, %v781_v0  ;;  %v193_v38 = vstv %s497_s17  ;;  %s835_s22 = sld [smem:[#allocation8 + $0x107]]  ;;  %v172_v54 = vadd.f32 %v171_v36, %v168_v39  ;;  %v152_v35 = vadd.f32 %v151_v25, %v149_v12 }
  0x37   :  { %v194_v41 = vmul.f32 %v193_v38, %v783_v1  ;;  %v197_v42 = vstv %s498_s0  ;;  %s839_s23 = sld [smem:[#allocation9 + $0x2]] }
  0x38   :  { %v198_v44 = vmul.f32 %v197_v42, %v795_v6  ;;  %v201_v45 = vstv %s499_s18  ;;  %s505_s1 = sld [smem:[#allocation8 + $0x180]]  ;;  %v176_v3 = vadd.f32 %v175_v52, %v172_v54  ;;  %570 = vtanh.f32 %v152_v35 }
  0x39   :  { %v195_v47 = vadd.f32 %v194_v41, %v191_v37  ;;  %v202_v48 = vmul.f32 %v201_v45, %v798_v10  ;;  %v205_v49 = vstv %s823_s19  ;;  %s506_s24 = sld [smem:[#allocation8 + $0x181]]  ;;  %v186_v37 = vstv %s814_s15 }
  0x3a   :  { %s507_s2 = sld [smem:[#allocation8 + $0x182]]  ;;  %v206_v56 = vmul.f32 %v205_v49, %v810_v17  ;;  %v209_v57 = vstv %s825_s20  ;;  %v180_v21 = vadd.f32 %v179_v61, %v176_v3 }
  0x3b   :  { %v199_v55 = vadd.f32 %v198_v44, %v195_v47  ;;  %s508_s3 = sld [smem:[#allocation8 + $0x183]]  ;;  %v210_v62 = vmul.f32 %v209_v57, %v818_v26  ;;  %v213_v63 = vstv %s831_s21 }
  0x3c   :  { %s852_s25 = sld [smem:[#allocation8 + $0x184]]  ;;  %v214_v13 = vmul.f32 %v213_v63, %v827_v31  ;;  %v217_v23 = vstv %s835_s22  ;;  %v184_v36 = vadd.f32 %v183_v22, %v180_v21 }
  0x3d   :  { %v203_v60 = vadd.f32 %v202_v48, %v199_v55  ;;  %s855_s5 = sld [smem:[#allocation8 + $0x185]]  ;;  %v218_v32 = vmul.f32 %v217_v23, %v845_v50  ;;  %v221_v43 = vstv %s839_s23 }
  0x3e   :  { %v225_v2 = vstv %s505_s1  ;;  %s860_s26 = sld [smem:[#allocation8 + $0x186]]  ;;  %v187_v52 = vadd.f32 %v186_v37, %v184_v36 }
  0x3f   :  { %v207_v4 = vadd.f32 %v206_v56, %v203_v60  ;;  %v226_v5 = vmul.f32 %v225_v2, %v781_v0  ;;  %v228_v7 = vstv %s506_s24  ;;  %s863_s27 = sld [smem:[#allocation8 + $0x187]] }
  0x40   :  { %v229_v9 = vmul.f32 %v228_v7, %v783_v1  ;;  %v232_v11 = vstv %s507_s2  ;;  %s867_s28 = sld [smem:[#allocation9 + $0x3]]  ;;  %572 = vtanh.f32 %v187_v52 }
  0x41   :  { %v233_v14 = vmul.f32 %v232_v11, %v795_v6  ;;  %v236_v15 = vstv %s508_s3  ;;  %s514_s29 = sld [smem:[#allocation8 + $0x200]]  ;;  %v211_v16 = vadd.f32 %v210_v62, %v207_v4 }
  0x42   :  { %v230_v18 = vadd.f32 %v229_v9, %v226_v5  ;;  %v237_v19 = vmul.f32 %v236_v15, %v798_v10  ;;  %v240_v20 = vstv %s852_s25  ;;  %s515_s8 = sld [smem:[#allocation8 + $0x201]] }
  0x43   :  { %v244_v24 = vstv %s855_s5  ;;  %s516_s9 = sld [smem:[#allocation8 + $0x202]]  ;;  %v241_v28 = vmul.f32 %v240_v20, %v810_v17  ;;  %v215_v30 = vadd.f32 %v214_v13, %v211_v16 }
  0x44   :  { %v234_v27 = vadd.f32 %v233_v14, %v230_v18  ;;  %s517_s10 = sld [smem:[#allocation8 + $0x203]]  ;;  %v248_v29 = vstv %s860_s26  ;;  %v245_v34 = vmul.f32 %v244_v24, %v818_v26 }
  0x45   :  { %s879_s11 = sld [smem:[#allocation8 + $0x204]]  ;;  %v249_v40 = vmul.f32 %v248_v29, %v827_v31  ;;  %v252_v44 = vstv %s863_s27  ;;  %v219_v47 = vadd.f32 %v218_v32, %v215_v30 }
  0x46   :  { %v238_v33 = vadd.f32 %v237_v19, %v234_v27  ;;  %s883_s12 = sld [smem:[#allocation8 + $0x205]]  ;;  %v253_v57 = vmul.f32 %v252_v44, %v845_v50  ;;  %v256_v4 = vstv %s867_s28 }
  0x47   :  { %v260_v38 = vstv %s514_s29  ;;  %s886_s30 = sld [smem:[#allocation8 + $0x206]]  ;;  %v222_v61 = vadd.f32 %v221_v43, %v219_v47 }
  0x48   :  { %v242_v39 = vadd.f32 %v241_v28, %v238_v33  ;;  %v261_v41 = vmul.f32 %v260_v38, %v781_v0  ;;  %v263_v42 = vstv %s515_s8  ;;  %s890_s13 = sld [smem:[#allocation8 + $0x207]] }
  0x49   :  { %v264_v45 = vmul.f32 %v263_v42, %v783_v1  ;;  %v267_v46 = vstv %s516_s9  ;;  %s895_s14 = sld [smem:[#allocation9 + $0x4]]  ;;  %574 = vtanh.f32 %v222_v61 }
  0x4a   :  { %v246_v48 = vadd.f32 %v245_v34, %v242_v39  ;;  %v268_v49 = vmul.f32 %v267_v46, %v795_v6  ;;  %v271_v51 = vstv %s517_s10  ;;  %s523_s4 = sld [smem:[#allocation8 + $0x280]] }
  0x4b   :  { %v265_v53 = vadd.f32 %v264_v45, %v261_v41  ;;  %v272_v54 = vmul.f32 %v271_v51, %v798_v10  ;;  %v275_v55 = vstv %s879_s11  ;;  %s524_s15 = sld [smem:[#allocation8 + $0x281]] }
  0x4c   :  { %v250_v56 = vadd.f32 %v249_v40, %v246_v48  ;;  %v279_v58 = vstv %s883_s12  ;;  %s525_s16 = sld [smem:[#allocation8 + $0x282]]  ;;  %v276_v60 = vmul.f32 %v275_v55, %v810_v17 }
  0x4d   :  { %v269_v59 = vadd.f32 %v268_v49, %v265_v53  ;;  %s903_s17 = sld [smem:[#allocation8 + $0x283]]  ;;  %v283_v62 = vstv %s886_s30  ;;  %v280_v2 = vmul.f32 %v279_v58, %v818_v26 }
  0x4e   :  { %s906_s0 = sld [smem:[#allocation8 + $0x284]]  ;;  %v254_v3 = vadd.f32 %v253_v57, %v250_v56  ;;  %v287_v5 = vstv %s890_s13  ;;  %v284_v9 = vmul.f32 %v283_v62, %v827_v31 }
  0x4f   :  { %v273_v63 = vadd.f32 %v272_v54, %v269_v59  ;;  %s909_s18 = sld [smem:[#allocation8 + $0x285]]  ;;  %v288_v16 = vmul.f32 %v287_v5, %v845_v50  ;;  %v291_v27 = vstv %s895_s14 }
  0x50   :  { %v295_v7 = vstv %s523_s4  ;;  %s913_s19 = sld [smem:[#allocation8 + $0x286]]  ;;  %v257_v20 = vadd.f32 %v256_v4, %v254_v3 }
  0x51   :  { %v277_v8 = vadd.f32 %v276_v60, %v273_v63  ;;  %v296_v11 = vmul.f32 %v295_v7, %v781_v0  ;;  %v298_v12 = vstv %s524_s15  ;;  %s917_s20 = sld [smem:[#allocation8 + $0x287]]  ;;  %v925_v0 = vpop.eup %570 }
  0x52   :  { %v299_v13 = vmul.f32 %v298_v12, %v783_v1  ;;  %v302_v14 = vstv %s525_s16  ;;  %s920_s21 = sld [smem:[#allocation9 + $0x5]]  ;;  %v929_v23 = vpop.eup %572  ;;  %576 = vtanh.f32 %v257_v20 }
  0x53   :  { %v281_v15 = vadd.f32 %v280_v2, %v277_v8  ;;  %v303_v18 = vmul.f32 %v302_v14, %v795_v6  ;;  %v306_v19 = vstv %s903_s17  ;;  %s329_s22 = sld [smem:[#allocation11]]  ;;  %v939_v32 = vpop.eup %574 }
  0x54   :  { %v300_v21 = vadd.f32 %v299_v13, %v296_v11  ;;  %v307_v22 = vmul.f32 %v306_v19, %v798_v10  ;;  %v310_v1 = vstv %s906_s0  ;;  %s532_s23 = sld [smem:[#allocation11 + $0x1]] }
  0x55   :  { %v285_v24 = vadd.f32 %v284_v9, %v281_v15  ;;  %v314_v25 = vstv %s909_s18  ;;  %s533_s1 = sld [smem:[#allocation11 + $0x2]]  ;;  %v311_v6 = vmul.f32 %v310_v1, %v810_v17 }
  0x56   :  { %v304_v28 = vadd.f32 %v303_v18, %v300_v21  ;;  %s934_s24 = sld [smem:[#allocation11 + $0x3]]  ;;  %v318_v30 = vstv %s913_s19  ;;  %v315_v33 = vmul.f32 %v314_v25, %v818_v26 }
  0x57   :  { %v289_v29 = vadd.f32 %v288_v16, %v285_v24  ;;  %s937_s2 = sld [smem:[#allocation11 + $0x4]]  ;;  %v322_v35 = vstv %s917_s20  ;;  %v319_v37 = vmul.f32 %v318_v30, %v827_v31 }
  0x58   :  { %v308_v10 = vadd.f32 %v307_v22, %v304_v28  ;;  %s942_s3 = sld [smem:[#allocation11 + $0x5]]  ;;  %v323_v42 = vmul.f32 %v322_v35, %v845_v50  ;;  %v952_v31 = vpop.eup %576  ;;  %v326_v47 = vstv %s920_s21 }
  0x59   :  { %v292_v34 = vadd.f32 %v291_v27, %v289_v29  ;;  %v330_v36 = vstv %s329_s22  ;;  %s945_s25 = sld [smem:[#allocation12]] }
  0x5a   :  { %v312_v17 = vadd.f32 %v311_v6, %v308_v10  ;;  %v331_v38 = vmul.f32 %v925_v0, %v330_v36  ;;  %v333_v39 = vstv %s532_s23  ;;  %s537_s5 = sld [smem:[#allocation11 + $0x80]] }
  0x5b   :  { %v334_v40 = vmul.f32 %v929_v23, %v333_v39  ;;  %v337_v41 = vstv %s533_s1  ;;  %s538_s26 = sld [smem:[#allocation11 + $0x81]]  ;;  %578 = vtanh.f32 %v292_v34 }
  0x5c   :  { %v316_v26 = vadd.f32 %v315_v33, %v312_v17  ;;  %s539_s27 = sld [smem:[#allocation11 + $0x82]]  ;;  %v338_v44 = vmul.f32 %v939_v32, %v337_v41  ;;  %v341_v46 = vstv %s934_s24 }
  0x5d   :  { %v335_v43 = vadd.f32 %v334_v40, %v331_v38  ;;  %s540_s28 = sld [smem:[#allocation11 + $0x83]]  ;;  %v342_v50 = vmul.f32 %v952_v31, %v341_v46  ;;  %v345_v56 = vstv %s937_s2 }
  0x5e   :  { %v320_v45 = vadd.f32 %v319_v37, %v316_v26  ;;  %s541_s29 = sld [smem:[#allocation11 + $0x84]]  ;;  %v349_v7 = vstv %s942_s3  ;;  %s720_s3 = smov [#allocation15]  }
  0x5f   :  { %s956_s8 = sld [smem:[#allocation11 + $0x85]]  ;;  %v339_v51 = vadd.f32 %v338_v44, %v335_v43  ;;  %v353_v27 = vstv %s945_s25  ;;  %s464_s25 = sshll.u32 %s720_s3, 4  ;;  %s465_s25 = int_to_ptr.vmem [resolvable:$true] %s464_s25 }
  0x60   :  { %v324_v48 = vadd.f32 %v323_v42, %v320_v45  ;;  %v357_v49 = vstv %s537_s5  ;;  %s958_s9 = sld [smem:[#allocation12 + $0x1]] }
  0x61   :  { %v358_v52 = vmul.f32 %v925_v0, %v357_v49  ;;  %v360_v53 = vstv %s538_s26  ;;  %s544_s10 = sld [smem:[#allocation11 + $0x100]]  ;;  %v962_v54 = vpop.eup %578  ;;  %v343_v63 = vadd.f32 %v342_v50, %v339_v51 }
  0x62   :  { %v327_v55 = vadd.f32 %v326_v47, %v324_v48  ;;  %v361_v57 = vmul.f32 %v929_v23, %v360_v53  ;;  %v364_v58 = vstv %s539_s27  ;;  %s545_s11 = sld [smem:[#allocation11 + $0x101]]  ;;  %v346_v2 = vmul.f32 %v962_v54, %v345_v56  ;;  %s466_s27 = sshll.u32 %s1015_s7, 4  ;;  %s467_s27 = int_to_ptr.hbm [resolvable:$true] %s466_s27 }
  0x63   :  { %v365_v59 = vmul.f32 %v939_v32, %v364_v58  ;;  %v368_v60 = vstv %s540_s28  ;;  %s546_s12 = sld [smem:[#allocation11 + $0x102]] }
  0x64   :  { %580 = vtanh.f32 %v327_v55  ;;  %v362_v61 = vadd.f32 %v361_v57, %v358_v52  ;;  %v369_v62 = vmul.f32 %v952_v31, %v368_v60  ;;  %s547_s30 = sld [smem:[#allocation11 + $0x103]]  ;;  %v372_v3 = vstv %s541_s29 }
  0x65   :  { %s969_s13 = sld [smem:[#allocation11 + $0x104]]  ;;  %v373_v5 = vmul.f32 %v962_v54, %v372_v3  ;;  %v376_v11 = vstv %s956_s8  ;;  %v347_v14 = vadd.f32 %v346_v2, %v343_v63 }
  0x66   :  { %v366_v4 = vadd.f32 %v365_v59, %v362_v61  ;;  %s972_s14 = sld [smem:[#allocation11 + $0x105]]  ;;  %v380_v28 = vstv %s958_s9 }
  0x67   :  { %v384_v8 = vstv %s544_s10  ;;  %s975_s4 = sld [smem:[#allocation12 + $0x2]] }
  0x68   :  { %v370_v9 = vadd.f32 %v369_v62, %v366_v4  ;;  %v385_v12 = vmul.f32 %v925_v0, %v384_v8  ;;  %v387_v13 = vstv %s545_s11  ;;  %s551_s15 = sld [smem:[#allocation11 + $0x180]] }
  0x69   :  { %v388_v15 = vmul.f32 %v929_v23, %v387_v13  ;;  %v391_v16 = vstv %s546_s12  ;;  %s980_s16 = sld [smem:[#allocation11 + $0x181]] }
  0x6a   :  { %v581_v18 = vpop.eup %580  ;;  %v374_v19 = vadd.f32 %v373_v5, %v370_v9  ;;  %v392_v20 = vmul.f32 %v939_v32, %v391_v16  ;;  %v395_v21 = vstv %s547_s30  ;;  %s553_s17 = sld [smem:[#allocation11 + $0x182]]  ;;  %v453_v9 = vstv %s1014_s6 }
  0x6b   :  { %v350_v22 = vmul.f32 %v581_v18, %v349_v7  ;;  %v377_v1 = vmul.f32 %v581_v18, %v376_v11  ;;  %v389_v24 = vadd.f32 %v388_v15, %v385_v12  ;;  %v396_v25 = vmul.f32 %v952_v31, %v395_v21  ;;  %s984_s0 = sld [smem:[#allocation11 + $0x183]] }
  0x6c   :  { %v399_v6 = vstv %s969_s13  ;;  %v403_v29 = vstv %s972_s14  ;;  %s990_s18 = sld [smem:[#allocation11 + $0x184]] }
  0x6d   :  { %v351_v30 = vadd.f32 %v350_v22, %v347_v14  ;;  %v378_v10 = vadd.f32 %v377_v1, %v374_v19  ;;  %v393_v33 = vadd.f32 %v392_v20, %v389_v24  ;;  %v400_v34 = vmul.f32 %v962_v54, %v399_v6  ;;  %s556_s19 = sld [smem:[#allocation11 + $0x185]] }
  0x6e   :  { %v404_v35 = vmul.f32 %v581_v18, %v403_v29  ;;  %v411_v36 = vstv %s551_s15  ;;  %s437_s20 = sld [smem:[#allocation14]]  ;;  %v407_v44 = vstv %s975_s4 }
  0x6f   :  { %v354_v17 = vadd.f32 %v353_v27, %v351_v30  ;;  %v381_v37 = vadd.f32 %v380_v28, %v378_v10  ;;  %v397_v38 = vadd.f32 %v396_v25, %v393_v33  ;;  %v412_v39 = vmul.f32 %v925_v0, %v411_v36  ;;  %s558_s21 = sld [smem:[#allocation14 + $0x1]] }
  0x70   :  { %v414_v40 = vstv %s980_s16  ;;  %v418_v41 = vstv %s553_s17  ;;  %s557_s22 = sld [smem:[#allocation12 + $0x3]] }
  0x71   :  { %v401_v26 = vadd.f32 %v400_v34, %v397_v38  ;;  %v415_v42 = vmul.f32 %v929_v23, %v414_v40  ;;  %v419_v43 = vmul.f32 %v939_v32, %v418_v41  ;;  %582 = vtanh.f32 %v354_v17  ;;  %s559_s23 = sld [smem:[#allocation14 + $0x2]] }
  0x72   :  { %v422_v45 = vstv %s984_s0  ;;  %v426_v46 = vstv %s990_s18  ;;  %584 = vtanh.f32 %v381_v37  ;;  %s560_s1 = sld [smem:[#allocation14 + $0x3]] }
  0x73   :  { %v405_v47 = vadd.f32 %v404_v35, %v401_v26  ;;  %v416_v48 = vadd.f32 %v415_v42, %v412_v39  ;;  %v423_v49 = vmul.f32 %v952_v31, %v422_v45  ;;  %v430_v0 = vstv %s556_s19 }
  0x74   :  { %v427_v52 = vmul.f32 %v962_v54, %v426_v46  ;;  %v431_v32 = vmul.f32 %v581_v18, %v430_v0  ;;  %v438_v57 = vstv %s437_s20 }
  0x75   :  { %v408_v51 = vadd.f32 %v407_v44, %v405_v47  ;;  %v420_v50 = vadd.f32 %v419_v43, %v416_v48  ;;  %v441_v58 = vstv %s558_s21 }
  0x76   :  { %v434_v59 = vstv %s557_s22 }
  0x77   :  { %586 = vtanh.f32 %v408_v51  ;;  %v424_v23 = vadd.f32 %v423_v49, %v420_v50  ;;  %v583_v53 = vpop.eup %582  ;;  %v445_v2 = vstv %s559_s23 }
  0x78   :  { %v585_v55 = vpop.eup %584  ;;  %v439_v61 = vmul.f32 %v583_v53, %v438_v57  ;;  %v449_v4 = vstv %s560_s1 }
  0x79   :  { %v428_v56 = vadd.f32 %v427_v52, %v424_v23  ;;  %v442_v62 = vmul.f32 %v585_v55, %v441_v58 }
  0x7b   :  { %v432_v60 = vadd.f32 %v431_v32, %v428_v56  ;;  %v443_v3 = vadd.f32 %v442_v62, %v439_v61 }
  0x7d   :  { %v587_v31 = vpop.eup %586  ;;  %v435_v63 = vadd.f32 %v434_v59, %v432_v60 }
  0x7e   :  { %v446_v54 = vmul.f32 %v587_v31, %v445_v2 }
  0x7f   :  { %588 = vtanh.f32 %v435_v63 }
  0x80   :  { %v447_v5 = vadd.f32 %v446_v54, %v443_v3 }
  0x85   :  { %v589_v7 = vpop.eup %588 }
  0x86   :  { %v450_v8 = vmul.f32 %v589_v7, %v449_v4 }
  0x88   :  { %v451_v11 = vadd.f32 %v450_v8, %v447_v5 }
  0x8a   :  { %v454_v12 = vadd.f32 %v453_v9, %v451_v11 }
  0x8c   :  { %590 = vtanh.f32 %v454_v12 }
  0x92   :  { %v591_v13 = vpop.eup %590 }
  0x93   :  { %v456_v14 = vmul.f32 0.5, %v591_v13 }
  0x95   :  { %v457_v15 = vadd.f32 0.5, %v456_v14 }
  0x97   :  { %458 = vst [vmem:[#allocation15] sm:$0xff] %v457_v15 }
  0x98   :  { %469 = dma.vmem_to_hbm [thread:$0]  %s465_s25, 128, %s467_s27, [#allocation5]  }
  0x99   :  { %710 = dma.done.wait [#allocation5], 128  }
  0x9a   :  { %711 = vsyncadd [#allocation5], 4294967168 }
  0x9b   :  { %474 = vsyncpa [#allocation4], 1 }
  0x9c   :  { %475 = vsyncpa [#allocation5], 1 }
  0x9d   :  { %476 = vsyncpa [#allocation6], 1 }
  0x9e   :  { %477 = vsyncpa [#allocation10], 1 }
  0x9f   :  { %478 = vsyncpa [#allocation7], 1 }
  0xa0   :  { %479 = vsyncpa [#allocation13], 1 }

</bundles_post_ra>
